<compile_context>
chip_gen: v6e
topology: v6e:2x2x1
jax: 0.10.0
libtpu: 0.0.40
codegen_flags: <defaults>
</compile_context>

<pallas_src>
import math

import jax
import jax.numpy as jnp
from jax.experimental import pallas as pl
from jax.experimental.pallas import tpu as pltpu


def rff2_kernel(x_ref, w_ref, b_ref, o_ref):
    # x_ref: (tm, D) f32
    # w_ref: (D, 2E) f32  (= 2*pi*e*[N | N], precomputed in the wrapper)
    # b_ref: (1, 2E) f32  (= [0...0 | pi/2...pi/2]; cos(p) == sin(p + pi/2))
    # o_ref: (tm, 2E)
    x = x_ref[...]                                   # (tm, D)
    W = w_ref[...]                                   # (D, 2E)
    b = b_ref[...]                                   # (1, 2E)
    D = x.shape[1]

    # proj = x @ W2 + bias as a sum of D rank-1 outer products (D tiny & static).
    # Exact f32 on the VPU; keeps the MXU out of the accuracy path.
    # TODO(synk): if bundle analysis on v7x shows the VALU binding here, switch
    # to jnp.dot(x, W, preferred_element_type=f32, precision=HIGHEST).
    proj = x[:, 0:1] * W[0:1, :] + b                 # (tm, 2E)
    for i in range(1, D):
        proj = proj + x[:, i:i + 1] * W[i:i + 1, :]

    # One lane-dense transcendental over the full 2E-wide feature block, then a
    # single lane-dense store: out = [sin(p) | sin(p + pi/2)] = [sin(p) | cos(p)].
    o_ref[...] = jnp.sin(proj).astype(o_ref.dtype)


def rff2_forward(x, N, e, *, tm=8192, out_dtype=None):
    """x: (Bs, Nt, D); N: (D, E); e: scalar (shape () or (1,)).
    Returns (Bs, Nt, 2*E) = concat([sin(2*pi*x@(e*N)), cos(...)], -1).

    out_dtype=jnp.bfloat16 is strongly recommended when downstream layers
    accept it: output bytes dominate HBM traffic ~40:1 over the input, so a
    bf16 store roughly halves the wall time on the mem-bound v5e/v6e parts.
    """
    Bs, Nt, D = x.shape
    Dn, E = N.shape
    assert Dn == D, (Dn, D)
    out_dim = 2 * E
    # Default keeps the module's dtype semantics (f32 in -> f32 out).
    out_dtype = out_dtype or x.dtype

    # Hoist all weight prep out of the kernel (tiny & resident):
    #   W2   = 2*pi * e * [N | N]                  (D, 2E)
    #   bias = [0...0 | pi/2...pi/2]               (1, 2E)   (cos via shifted sin)
    scale = (2.0 * math.pi) * jnp.asarray(e, jnp.float32).reshape(())
    Nf = jnp.asarray(N, jnp.float32)
    W2 = scale * jnp.concatenate([Nf, Nf], axis=1)                  # (D, 2E)
    bias = jnp.concatenate(
        [jnp.zeros((1, E), jnp.float32),
         jnp.full((1, E), 0.5 * math.pi, jnp.float32)], axis=1)     # (1, 2E)

    M = Bs * Nt
    x2 = x.reshape(M, D).astype(jnp.float32)

    # Large row tile to amortize the fixed per-grid-step pipeline overhead.
    # No pad / slice: a cdiv grid with a ragged last tile is handled by Pallas
    # partial-block masking (OOB input rows only feed dropped output rows).
    tm = max(8, (tm // 8) * 8)            # keep the tile 8-row aligned
    if M <= tm:
        tm_eff = M                        # single block == full row extent
        grid = (1,)
    else:
        tm_eff = tm
        grid = (pl.cdiv(M, tm_eff),)

    # NOTE: for E >= 64 the 2E-wide output store is lane-dense (multiple of
    # 128). For smaller embed_dim, consider folding row tiles so the stored
    # last dim stays a multiple of 128 (masked partial stores are slow).
    out = pl.pallas_call(
        rff2_kernel,
        out_shape=jax.ShapeDtypeStruct((M, out_dim), out_dtype),
        grid_spec=pltpu.PrefetchScalarGridSpec(
            num_scalar_prefetch=0,
            grid=grid,
            in_specs=[
                pl.BlockSpec((tm_eff, D), lambda m: (m, 0)),        # row tile of x
                pl.BlockSpec((D, out_dim), lambda m: (0, 0)),       # resident W2
                pl.BlockSpec((1, out_dim), lambda m: (0, 0)),       # resident bias
            ],
            out_specs=pl.BlockSpec((tm_eff, out_dim), lambda m: (m, 0)),
        ),
        compiler_params=pltpu.CompilerParams(
            dimension_semantics=("parallel",),   # shards grid steps across TCs (v7x)
            # VMEM budget at tm=8192, E=64, f32 out (double-buffered):
            #   x block  : 8192 * 128(lane pad) * 4 B * 2 ~= 8 MiB
            #   out block: 8192 * 128           * 4 B * 2 ~= 8 MiB
            # ~16 MiB total: fits the 32 MiB scoped limit and leaves headroom
            # on v7x (64 MiB physical) as well as v5e/v6e (128 MiB).
            vmem_limit_bytes=32 * 1024 * 1024,
        ),
    )(x2, W2, bias)

    return out.reshape(Bs, Nt, out_dim)


def rff2_reference(x, N, e):
    """Pure-JAX reference mirroring the PyTorch forward (B = e*N, Tancik RFF)."""
    B = jnp.asarray(e, jnp.float32).reshape(()) * jnp.asarray(N, jnp.float32)
    proj = 2.0 * math.pi * jnp.einsum(
        '...d,de->...e', x.astype(jnp.float32), B,
        precision=jax.lax.Precision.HIGHEST)
    return jnp.concatenate([jnp.sin(proj), jnp.cos(proj)], axis=-1)


if __name__ == "__main__":
    # Small shapes consistent with the module: x (Bs, Nt, input_dim).
    input_dim, embed_dim, scale = 3, 64, 1.0
    Bs, Nt = 2, 8

    # Module parameters exactly as in __init__ (deterministic).
    N = jnp.ones((input_dim, embed_dim), jnp.float32) / input_dim / embed_dim
    e = jnp.asarray([scale], jnp.float32)

    x = jax.random.normal(jax.random.PRNGKey(0), (Bs, Nt, input_dim),
                          dtype=jnp.float32)

    out = jax.block_until_ready(rff2_forward(x, N, e))
    ref = rff2_reference(x, N, e)
    assert out.shape == (Bs, Nt, 2 * embed_dim), out.shape
    # sin/cos outputs are O(1); cos(p)=sin(p+pi/2) introduces only ulp-level
    # differences vs jnp.cos for O(1) arguments -> 5e-5 abs tolerance.
    assert jnp.allclose(out, ref, atol=5e-5, rtol=5e-5), "mismatch vs reference"

    # Second check: multi-step grid with a ragged (partial) last tile, no
    # padding/slicing on the host side (tm override forces several steps).
    x_big = jax.random.normal(jax.random.PRNGKey(1), (2, 1500, input_dim),
                              dtype=jnp.float32)
    out_big = jax.block_until_ready(rff2_forward(x_big, N, e, tm=512))
    ref_big = rff2_reference(x_big, N, e)
    assert out_big.shape == (2, 1500, 2 * embed_dim), out_big.shape
    assert jnp.allclose(out_big, ref_big, atol=5e-5, rtol=5e-5), \
        "mismatch vs reference (tiled / ragged path)"

    # Third check: bf16 output path (recommended for the store-bound regime).
    out_bf16 = jax.block_until_ready(
        rff2_forward(x, N, e, out_dtype=jnp.bfloat16))
    assert out_bf16.dtype == jnp.bfloat16
    assert jnp.allclose(out_bf16.astype(jnp.float32), ref, atol=1e-2), \
        "mismatch vs reference (bf16 output)"

    print("KERNEL_OK")
</pallas_src>

<mosaic_0001>
module attributes {stable_mosaic.version = 11 : i64} {
  func.func @rff2_kernel(%arg0: i32, %arg1: memref<16x3xf32, #tpu.memory_space<vmem>>, %arg2: memref<3x128xf32, #tpu.memory_space<vmem>>, %arg3: memref<1x128xf32, #tpu.memory_space<vmem>>, %arg4: memref<16x128xf32, #tpu.memory_space<vmem>>) attributes {dimension_semantics = [#tpu.dimension_semantics<parallel>], iteration_bounds = array<i64: 1>, scalar_prefetch = 0 : i64, scratch_operands = 0 : i64, tpu.core_type = #tpu.core_type<tc>, window_params = [{transform_indices = @transform_0, window_bounds = array<i64: 16, 3>}, {pipeline_mode = #tpu.pipeline_mode<synchronous>, transform_indices = @transform_1, window_bounds = array<i64: 3, 128>}, {pipeline_mode = #tpu.pipeline_mode<synchronous>, transform_indices = @transform_2, window_bounds = array<i64: 1, 128>}, {transform_indices = @transform_3, window_bounds = array<i64: 16, 128>}]} {
    %c0 = arith.constant 0 : index
    %c0_0 = arith.constant 0 : index
    %0 = vector.load %arg1[%c0, %c0_0] : memref<16x3xf32, #tpu.memory_space<vmem>>, vector<16x3xf32>
    %c0_1 = arith.constant 0 : index
    %c0_2 = arith.constant 0 : index
    %1 = vector.load %arg2[%c0_1, %c0_2] : memref<3x128xf32, #tpu.memory_space<vmem>>, vector<3x128xf32>
    %c0_3 = arith.constant 0 : index
    %c0_4 = arith.constant 0 : index
    %2 = vector.load %arg3[%c0_3, %c0_4] : memref<1x128xf32, #tpu.memory_space<vmem>>, vector<1x128xf32>
    %3 = vector.extract_strided_slice %0 {offsets = [0, 0], sizes = [16, 1], strides = [1, 1]} : vector<16x3xf32> to vector<16x1xf32>
    %4 = vector.extract_strided_slice %1 {offsets = [0, 0], sizes = [1, 128], strides = [1, 1]} : vector<3x128xf32> to vector<1x128xf32>
    %5 = vector.broadcast %3 : vector<16x1xf32> to vector<16x128xf32>
    %6 = vector.broadcast %4 : vector<1x128xf32> to vector<16x128xf32>
    %7 = arith.mulf %5, %6 : vector<16x128xf32>
    %8 = vector.broadcast %2 : vector<1x128xf32> to vector<16x128xf32>
    %9 = arith.addf %7, %8 : vector<16x128xf32>
    %10 = vector.extract_strided_slice %0 {offsets = [0, 1], sizes = [16, 1], strides = [1, 1]} : vector<16x3xf32> to vector<16x1xf32>
    %11 = vector.extract_strided_slice %1 {offsets = [1, 0], sizes = [1, 128], strides = [1, 1]} : vector<3x128xf32> to vector<1x128xf32>
    %12 = vector.broadcast %10 : vector<16x1xf32> to vector<16x128xf32>
    %13 = vector.broadcast %11 : vector<1x128xf32> to vector<16x128xf32>
    %14 = arith.mulf %12, %13 : vector<16x128xf32>
    %15 = arith.addf %9, %14 : vector<16x128xf32>
    %16 = vector.extract_strided_slice %0 {offsets = [0, 2], sizes = [16, 1], strides = [1, 1]} : vector<16x3xf32> to vector<16x1xf32>
    %17 = vector.extract_strided_slice %1 {offsets = [2, 0], sizes = [1, 128], strides = [1, 1]} : vector<3x128xf32> to vector<1x128xf32>
    %18 = vector.broadcast %16 : vector<16x1xf32> to vector<16x128xf32>
    %19 = vector.broadcast %17 : vector<1x128xf32> to vector<16x128xf32>
    %20 = arith.mulf %18, %19 : vector<16x128xf32>
    %21 = arith.addf %15, %20 : vector<16x128xf32>
    %22 = math.sin %21 : vector<16x128xf32>
    %c0_5 = arith.constant 0 : index
    %c0_6 = arith.constant 0 : index
    %23 = vector.load %arg4[%c0_5, %c0_6] : memref<16x128xf32, #tpu.memory_space<vmem>>, vector<16x128xf32>
    tpu.vector_store %arg4[%c0_5, %c0_6], %22 {strides = array<i32>} : memref<16x128xf32, #tpu.memory_space<vmem>>, vector<16x128xf32>,
    return
  }
  func.func @transform_0(%arg0: i32) -> (i32, i32) {
    %c0_i32 = arith.constant 0 : i32
    %c0_i32_0 = arith.constant 0 : i32
    return %arg0, %c0_i32 : i32, i32
  }
  func.func @transform_1(%arg0: i32) -> (i32, i32) {
    %c0_i32 = arith.constant 0 : i32
    %c0_i32_0 = arith.constant 0 : i32
    %c0_i32_1 = arith.constant 0 : i32
    return %c0_i32, %c0_i32_0 : i32, i32
  }
  func.func @transform_2(%arg0: i32) -> (i32, i32) {
    %c0_i32 = arith.constant 0 : i32
    %c0_i32_0 = arith.constant 0 : i32
    %c0_i32_1 = arith.constant 0 : i32
    return %c0_i32, %c0_i32_0 : i32, i32
  }
  func.func @transform_3(%arg0: i32) -> (i32, i32) {
    %c0_i32 = arith.constant 0 : i32
    %c0_i32_0 = arith.constant 0 : i32
    return %arg0, %c0_i32 : i32, i32
  }
}

</mosaic_0001>

<bundles_post_ra>
// kernel: tpu_custom_call.1
= control target key start
LH: loop header
LB: loop body
LE: loop exit
PB: predicated region body
PF: predicated region fallthrough
CT: control target
= control target key end

     0   :  { %v364_v1 = vmov 1   ;;  %v365_v2 = vmov 0   ;;  %s481_s0 = inlined_call_operand.vmem [shape: f32[16,3], index: 0, kind: input, shape index: {}]   ;;  %s482_s1 = inlined_call_operand.vmem [shape: f32[3,128], index: 1, kind: input, shape index: {}]   ;;  %s483_s2 = inlined_call_operand.vmem [shape: f32[1,128], index: 2, kind: input, shape index: {}]   ;;  %s484_s3 = inlined_call_operand.hbm [shape: f32[16,128], index: 3, kind: output, shape index: {}]  }
   0x1   :  { %v15_v0 = vld [vmem:[%s481_s0] sm:$0xff]  ;;  %331 = vset.pattern.permute.xlu1 %v364_v1  ;;  %330 = vset.pattern.permute.xlu0 %v365_v2 }
   0x2   :  { %8 = vsyncpa [#allocation3], 0  ;;  %44 = vperm.xlu1 %331, %v15_v0   ;;  %21 = vperm.xlu0 %330, %v15_v0   ;;  %v16_v3 = vld [vmem:[%s481_s0 + $0x8] sm:$0xff]  ;;  %v366_v4 = vmov 2   ;;  %v29_v5 = vlaneseq  ;;  %v17_v8 = vld [vmem:[%s482_s1] sm:$0x7] }
   0x3   :  { %v301_v15 = vld [vmem:[%s483_s2] ss:$0 sm:$0xff]  ;;  %v367_v53 = vmov 683565275   ;;  %v368_v57 = vmov 2475754826  }
   0x4   :  { %v30_v6 = vshrl.u32 %v29_v5, 7  ;;  %v369_v59 = vmov 2131351028   ;;  %v370_v61 = vmov 2102212464   ;;  %s373_s1 = smov [#allocation2]  }
   0x5   :  { %v371_v63 = vmov 920167782   ;;  %s290_s2 = sshll.u32 %s373_s1, 4  ;;  %s291_s2 = int_to_ptr.vmem [resolvable:$true] %s290_s2 }
   0x6   :  { %48 = vperm.xlu1 %331, %v16_v3   ;;  %26 = vperm.xlu0 %330, %v16_v3   ;;  %v31_v7 = vsub.s32 0, %v30_v6  ;;  %v53_v10 = vsub.s32 1, %v30_v6  ;;  %v69_v14 = vsub.s32 2, %v30_v6  ;;  %v372_v6 = vmov 1326507024   ;;  %s342_s19 = scalar_lea.vmem %s291_s2, 256  ;;  %p347_p1 = scmp.lt.s32.totalorder %s291_s2, %s291_s2 }
   0x7   :  { %p343_p0 = scmp.ne.s32.totalorder %s291_s2, %s342_s19  ;;  %p348_p2 = scmp.lt.s32.totalorder %s342_s19, %s342_s19 }
   0x8   :  { %v32_v9 = vrot.slane %v17_v8, %v31_v7  ;;  %v54_v16 = vrot.slane %v17_v8, %v53_v10  ;;  %v70_v21 = vrot.slane %v17_v8, %v69_v14 }
   0x9   :  { %p349_p3 = por %p348_p2, %p347_p1 }
   0xa   :  { %333 = vset.pattern.permute.xlu1 %v366_v4  ;;  %332 = vset.pattern.permute.xlu0 %v366_v4 }
   0xb   :  { %64 = vperm.xlu1 %333, %v16_v3   ;;  %60 = vperm.xlu0 %332, %v15_v0   ;;  %p350_p4 = pnand %p349_p3, %p343_p0 }
  0x7d   :  { %v45_v11 = vpop.permute.xlu1 %44  ;;  %v22_v12 = vpop.permute.xlu0 %21 }
  0x7e   :  { %v33_v13 = vmul.f32 %v32_v9, %v22_v12  ;;  %v55_v24 = vmul.f32 %v54_v16, %v45_v11 }
  0x80   :  { %v41_v20 = vadd.f32 %v301_v15, %v33_v13 }
  0x81   :  { %v49_v17 = vpop.permute.xlu1 %48  ;;  %v27_v18 = vpop.permute.xlu0 %26 }
  0x82   :  { %v34_v19 = vmul.f32 %v32_v9, %v27_v18  ;;  %v56_v22 = vmul.f32 %v54_v16, %v49_v17  ;;  %v57_v29 = vadd.f32 %v55_v24, %v41_v20 }
  0x84   :  { %v42_v23 = vadd.f32 %v301_v15, %v34_v19 }
  0x86   :  { %v65_v25 = vpop.permute.xlu1 %64  ;;  %v58_v26 = vadd.f32 %v56_v22, %v42_v23  ;;  %v61_v27 = vpop.permute.xlu0 %60 }
  0x87   :  { %v72_v28 = vmul.f32 %v70_v21, %v65_v25  ;;  %v71_v30 = vmul.f32 %v70_v21, %v61_v27 }
  0x89   :  { %v408_v31 = vadd.f32 %v72_v28, %v58_v26  ;;  %v410_v32 = vadd.f32 %v71_v30, %v57_v29 }
  0x8b   :  { %v179_v33 = vand.u32 2147483647, %v408_v31  ;;  %v182_v34 = vand.u32 2139095040, %v408_v31  ;;  %v78_v35 = vand.u32 2139095040, %v410_v32  ;;  %v75_v38 = vand.u32 2147483647, %v410_v32 }
  0x8c   :  { %vm181_vm14 = vcmp.lt.s32.totalorder %v408_v31, 0 }
  0x8d   :  { %v183_v36 = vshrl.u32 %v182_v34, 23  ;;  %v186_v37 = vand.u32 8388607, %v179_v33  ;;  %v79_v39 = vshrl.u32 %v78_v35, 23  ;;  %v420_v44 = vand.u32 8388607, %v75_v38 }
  0x8e   :  { %vm463_vm15 = vcmp.le.f32.partialorder %v179_v33, 0.7853982 }
  0x8f   :  { %v306_v40 = vadd.s32 4294967169, %v183_v36  ;;  %v302_v41 = vadd.s32 4294967169, %v79_v39  ;;  %v187_v43 = vor.u32 8388608, %v186_v37  ;;  %v83_v51 = vor.u32 8388608, %v420_v44 }
  0x91   :  { %v189_v42 = vadd.s32 1, %v306_v40  ;;  %v85_v45 = vadd.s32 1, %v302_v41  ;;  %v422_v50 = vshll.u32 %v187_v43, 8 }
  0x93   :  { %vm190_vm0 = vcmp.gt.s32.totalorder %v189_v42, 0  ;;  %vm86_vm1 = vcmp.gt.s32.totalorder %v85_v45, 0 }
  0x94   :  { %v191_v46 = vsel %vm190_vm0, %v189_v42, 0  ;;  %v87_v49 = vsel %vm86_vm1, %v85_v45, 0  ;;  %v123_v45 = vshll.u32 %v83_v51, 8  ;;  %vm77_vm0 = vcmp.lt.s32.totalorder %v410_v32, 0 }
  0x95   :  { %v192_v47 = vshrl.u32 %v191_v46, 5  ;;  %v193_v48 = vand.u32 31, %v191_v46  ;;  %v425_v55 = vshrl.u32 %v87_v49, 5  ;;  %v89_v56 = vand.u32 31, %v87_v49 }
  0x96   :  { %vm76_vm1 = vcmp.le.f32.partialorder %v75_v38, 0.7853982 }
  0x97   :  { %v194_v52 = vsub.s32 32, %v193_v48  ;;  %v196_v54 = vshll.u32 %v367_v53, %v193_v48  ;;  %v199_v58 = vshll.u32 %v368_v57, %v193_v48  ;;  %v202_v60 = vshll.u32 %v369_v59, %v193_v48 }
  0x98   :  { %v205_v62 = vshll.u32 %v370_v61, %v193_v48  ;;  %v208_v0 = vshll.u32 %v371_v63, %v193_v48  ;;  %vm211_vm2 = vcmp.lt.s32.totalorder %v192_v47, 1  ;;  %vm212_vm3 = vcmp.lt.s32.totalorder %v192_v47, 2 }
  0x99   :  { %v197_v1 = vshrl.u32 %v368_v57, %v194_v52  ;;  %v200_v2 = vshrl.u32 %v369_v59, %v194_v52  ;;  %v203_v3 = vshrl.u32 %v370_v61, %v194_v52  ;;  %v195_v4 = vshrl.u32 %v367_v53, %v194_v52 }
  0x9a   :  { %v206_v5 = vshrl.u32 %v371_v63, %v194_v52  ;;  %v209_v7 = vshrl.u32 %v372_v6, %v194_v52  ;;  %v90_v11 = vsub.s32 32, %v89_v56  ;;  %vm213_vm4 = vcmp.lt.s32.totalorder %v192_v47, 3 }
  0x9b   :  { %v198_v8 = vor.u32 %v197_v1, %v196_v54  ;;  %v201_v9 = vor.u32 %v200_v2, %v199_v58  ;;  %v204_v10 = vor.u32 %v203_v3, %v202_v60  ;;  %vm214_vm5 = vcmp.lt.s32.totalorder %v192_v47, 4 }
  0x9c   :  { %v207_v12 = vor.u32 %v206_v5, %v205_v62  ;;  %v210_v13 = vor.u32 %v209_v7, %v208_v0  ;;  %v92_v21 = vshll.u32 %v367_v53, %v89_v56  ;;  %v93_v24 = vshrl.u32 %v368_v57, %v90_v11 }
  0x9d   :  { %v215_v14 = vsel %vm211_vm2, %v195_v4, %v198_v8  ;;  %v216_v15 = vsel %vm214_vm5, %v204_v10, 2102212464  ;;  %v219_v16 = vsel %vm211_vm2, %v198_v8, %v201_v9  ;;  %v223_v17 = vsel %vm211_vm2, %v201_v9, %v204_v10 }
  0x9e   :  { %v217_v18 = vsel %vm213_vm4, %v201_v9, %v216_v15  ;;  %v220_v19 = vsel %vm214_vm5, %v207_v12, 920167782  ;;  %v224_v20 = vsel %vm214_vm5, %v210_v13, 1326507024  ;;  %v95_v25 = vshll.u32 %v368_v57, %v89_v56 }
  0x9f   :  { %v221_v22 = vsel %vm213_vm4, %v204_v10, %v220_v19  ;;  %v225_v23 = vsel %vm213_vm4, %v207_v12, %v224_v20  ;;  %v218_v26 = vsel %vm212_vm3, %v215_v14, %v217_v18  ;;  %v96_v29 = vshrl.u32 %v369_v59, %v90_v11 }
  0xa0   :  { %v222_v27 = vsel %vm212_vm3, %v219_v16, %v221_v22  ;;  %v226_v28 = vsel %vm212_vm3, %v223_v17, %v225_v23  ;;  %v94_v37 = vor.u32 %v93_v24, %v92_v21  ;;  %v98_v40 = vshll.u32 %v369_v59, %v89_v56 }
  0xa1   :  { %v434_v30 = vmul.u32.u64.low %v422_v50, %v226_v28  ;;  %v435_v34 = vmul.u32.u64.high %v422_v50, %v226_v28, %v434_v30  ;;  %v438_v35 = vmul.u32.u64.low %v422_v50, %v222_v27  ;;  %v439_v36 = vmul.u32.u64.high %v422_v50, %v222_v27, %v438_v35 }
  0xa2   :  { %v97_v39 = vor.u32 %v96_v29, %v95_v25  ;;  %v99_v41 = vshrl.u32 %v370_v61, %v90_v11  ;;  %v101_v42 = vshll.u32 %v370_v61, %v89_v56  ;;  %v102_v43 = vshrl.u32 %v371_v63, %v90_v11 }
  0xa3   :  { %v105_v44 = vshrl.u32 %v372_v6, %v90_v11  ;;  %v234_v46 = vmul.u32 %v422_v50, %v218_v26  ;;  %v91_v47 = vshrl.u32 %v367_v53, %v90_v11  ;;  %v104_v49 = vshll.u32 %v371_v63, %v89_v56 }
  0xa4   :  { %v100_v48 = vor.u32 %v99_v41, %v98_v40  ;;  %vm236_vm6 = vc.u32 %v435_v34, %v438_v35  ;;  %v237_v52 = vadd.s32 1, %v439_v36  ;;  %v103_v54 = vor.u32 %v102_v43, %v101_v42 }
  0xa5   :  { %vm107_vm7 = vcmp.lt.s32.totalorder %v425_v55, 1  ;;  %v106_v57 = vor.u32 %v105_v44, %v104_v49  ;;  %vm109_vm8 = vcmp.lt.s32.totalorder %v425_v55, 3  ;;  %vm110_vm9 = vcmp.lt.s32.totalorder %v425_v55, 4 }
  0xa6   :  { %v115_v58 = vsel %vm107_vm7, %v94_v37, %v97_v39  ;;  %v238_v51 = vsel %vm236_vm6, %v237_v52, %v439_v36  ;;  %v112_v59 = vsel %vm110_vm9, %v100_v48, 2102212464  ;;  %v116_v50 = vsel %vm110_vm9, %v103_v54, 920167782 }
  0xa7   :  { %v119_v53 = vsel %vm107_vm7, %v97_v39, %v100_v48  ;;  %v239_v60 = vadd.s32 %v238_v51, %v234_v46  ;;  %vm108_vm10 = vcmp.lt.s32.totalorder %v425_v55, 2  ;;  %v117_v56 = vsel %vm109_vm8, %v100_v48, %v116_v50 }
  0xa8   :  { %v120_v61 = vsel %vm110_vm9, %v106_v57, 1326507024  ;;  %v111_v62 = vsel %vm107_vm7, %v91_v47, %v94_v37  ;;  %v113_v63 = vsel %vm109_vm8, %v97_v39, %v112_v59  ;;  %v118_v0 = vsel %vm108_vm10, %v115_v58, %v117_v56 }
  0xa9   :  { %v121_v1 = vsel %vm109_vm8, %v103_v54, %v120_v61  ;;  %v240_v2 = vadd.s32 536870912, %v239_v60  ;;  %v449_v4 = vmul.u32.u64.low %v123_v45, %v118_v0  ;;  %v450_v5 = vmul.u32.u64.high %v123_v45, %v118_v0, %v449_v4 }
  0xaa   :  { %v122_v3 = vsel %vm108_vm10, %v119_v53, %v121_v1  ;;  %v114_v9 = vsel %vm108_vm10, %v111_v62, %v113_v63  ;;  %v235_v25 = vadd.s32 %v438_v35, %v435_v34  ;;  %vm271_vm5 = vweird.f32 %v408_v31 }
  0xab   :  { %v452_v6 = vmul.u32.u64.low %v123_v45, %v122_v3  ;;  %v453_v7 = vmul.u32.u64.high %v123_v45, %v122_v3, %v452_v6  ;;  %v241_v8 = vshrl.u32 %v240_v2, 30  ;;  %v133_v11 = vadd.s32 1, %v450_v5 }
  0xac   :  { %v130_v55 = vmul.u32 %v123_v45, %v114_v9  ;;  %vm167_vm9 = vweird.f32 %v410_v32 }
  0xad   :  { %v242_v10 = vshll.u32 %v241_v8, 30  ;;  %vm132_vm11 = vc.u32 %v453_v7, %v449_v4  ;;  %v131_v46 = vadd.s32 %v449_v4, %v453_v7  ;;  %v265_v57 = vsub.s32 4, %v241_v8 }
  0xae   :  { %v134_v13 = vsel %vm132_vm11, %v133_v11, %v450_v5 }
  0xaf   :  { %v243_v12 = vsub.s32 %v239_v60, %v242_v10  ;;  %v135_v14 = vadd.s32 %v134_v13, %v130_v55  ;;  %v266_v56 = vsel %vm181_vm14, %v265_v57, %v241_v8 }
  0xb0   :  { %v268_v0 = vsel %vm463_vm15, 0, %v266_v56 }
  0xb1   :  { %v245_v15 = vsub.s32 0, %v243_v12  ;;  %v136_v16 = vadd.s32 536870912, %v135_v14  ;;  %v272_v3 = vadd.s32 3, %v268_v0 }
  0xb3   :  { %v307_v17 = vmin.u32 %v245_v15, %v243_v12  ;;  %v137_v18 = vshrl.u32 %v136_v16, 30  ;;  %v273_v6 = vand.u32 3, %v272_v3 }
  0xb5   :  { %v247_v19 = vclz %v307_v17  ;;  %v138_v20 = vshll.u32 %v137_v18, 30  ;;  %v161_v33 = vsub.s32 4, %v137_v18  ;;  %vm278_vm2 = vcmp.eq.s32.totalorder %v273_v6, 2 }
  0xb6   :  { %vm275_vm3 = vcmp.eq.s32.totalorder %v273_v6, 0  ;;  %vm274_vm4 = vcmp.lt.s32.totalorder %v273_v6, 2 }
  0xb7   :  { %v308_v21 = vadd.s32 4294967294, %v247_v19  ;;  %v139_v22 = vsub.s32 %v135_v14, %v138_v20  ;;  %v162_v5 = vsel %vm77_vm0, %v161_v33, %v137_v18 }
  0xb8   :  { %v164_v8 = vsel %vm76_vm1, 0, %v162_v5 }
  0xb9   :  { %vm309_vm12 = vcmp.lt.s32.totalorder %v308_v21, 0  ;;  %v141_v24 = vsub.s32 0, %v139_v22  ;;  %v168_v55 = vadd.s32 3, %v164_v8 }
  0xba   :  { %v250_v23 = vsel %vm309_vm12, 0, %v308_v21 }
  0xbb   :  { %v251_v26 = vsub.s32 32, %v250_v23  ;;  %v255_v27 = vsub.s32 4294967266, %v250_v23  ;;  %v303_v28 = vmin.u32 %v141_v24, %v139_v22  ;;  %v252_v29 = vshll.u32 %v243_v12, %v250_v23 }
  0xbc   :  { %v169_v15 = vand.u32 3, %v168_v55 }
  0xbd   :  { %v253_v30 = vshrl.u32 %v235_v25, %v251_v26  ;;  %v256_v36 = vadd.s32 127, %v255_v27  ;;  %v143_v37 = vclz %v303_v28 }
  0xbe   :  { %vm174_vm6 = vcmp.eq.s32.totalorder %v169_v15, 2  ;;  %vm171_vm7 = vcmp.eq.s32.totalorder %v169_v15, 0  ;;  %vm170_vm8 = vcmp.lt.s32.totalorder %v169_v15, 2 }
  0xbf   :  { %v254_v39 = vor.u32 %v253_v30, %v252_v29  ;;  %v257_v40 = vshll.u32 %v256_v36, 23  ;;  %v304_v41 = vadd.s32 4294967294, %v143_v37 }
  0xc1   :  { %v258_v42 = vor.u32 4788187, %v257_v40  ;;  %vm305_vm13 = vcmp.lt.s32.totalorder %v304_v41, 0  ;;  %v261_v44 = vcvt.s32.f32 %v254_v39 }
  0xc2   :  { %v146_v45 = vsel %vm305_vm13, 0, %v304_v41 }
  0xc3   :  { %v259_v43 = vand.u32 2147483647, %v258_v42  ;;  %v147_v47 = vsub.s32 32, %v146_v45  ;;  %v151_v48 = vsub.s32 4294967266, %v146_v45  ;;  %v148_v35 = vshll.u32 %v139_v22, %v146_v45 }
  0xc5   :  { %v262_v34 = vmul.f32 %v261_v44, %v259_v43  ;;  %v149_v49 = vshrl.u32 %v131_v46, %v147_v47  ;;  %v152_v52 = vadd.s32 127, %v151_v48 }
  0xc7   :  { %v263_v54 = vxor.u32 2147483648, %v262_v34  ;;  %v150_v58 = vor.u32 %v149_v49, %v148_v35  ;;  %v153_v51 = vshll.u32 %v152_v52, 23 }
  0xc9   :  { %v264_v50 = vsel %vm181_vm14, %v263_v54, %v262_v34  ;;  %v154_v60 = vor.u32 4788187, %v153_v51  ;;  %v157_v62 = vcvt.s32.f32 %v150_v58 }
  0xca   :  { %v267_v53 = vsel %vm463_vm15, %v408_v31, %v264_v50 }
  0xcb   :  { %334 = vcosq.f32 %v267_v53  ;;  %v155_v61 = vand.u32 2147483647, %v154_v60 }
  0xcc   :  { %336 = vsinq.f32 %v267_v53 }
  0xcd   :  { %v158_v63 = vmul.f32 %v157_v62, %v155_v61 }
  0xcf   :  { %v159_v1 = vxor.u32 2147483648, %v158_v63 }
  0xd1   :  { %v160_v2 = vsel %vm77_vm0, %v159_v1, %v158_v63 }
  0xd2   :  { %v163_v4 = vsel %vm76_vm1, %v410_v32, %v160_v2 }
  0xd3   :  { %338 = vcosq.f32 %v163_v4 }
  0xd4   :  { %340 = vsinq.f32 %v163_v4 }
  0xd8   :  { %v335_v7 = vpop.eup %334 }
  0xd9   :  { %v337_v9 = vpop.eup %336  ;;  %v279_v10 = vxor.u32 2147483648, %v335_v7 }
  0xda   :  { %v276_v11 = vxor.u32 2147483648, %v337_v9 }
  0xdb   :  { %v280_v12 = vsel %vm278_vm2, %v279_v10, %v337_v9 }
  0xdc   :  { %v277_v13 = vsel %vm275_vm3, %v335_v7, %v276_v11 }
  0xdd   :  { %v281_v38 = vsel %vm274_vm4, %v277_v13, %v280_v12 }
  0xde   :  { %v282_v14 = vsel %vm271_vm5, nan, %v281_v38 }
  0xdf   :  { %284 = vst [vmem:[#allocation2 + $0x8] sm:$0xff] %v282_v14 }
  0xe0   :  { %v339_v16 = vpop.eup %338 }
  0xe1   :  { %v341_v17 = vpop.eup %340  ;;  %v175_v18 = vxor.u32 2147483648, %v339_v16 }
  0xe2   :  { %v172_v19 = vxor.u32 2147483648, %v341_v17 }
  0xe3   :  { %v176_v20 = vsel %vm174_vm6, %v175_v18, %v341_v17 }
  0xe4   :  { %v173_v21 = vsel %vm171_vm7, %v339_v16, %v172_v19 }
  0xe5   :  { %v177_v22 = vsel %vm170_vm8, %v173_v21, %v176_v20 }
  0xe6   :  { %v178_v31 = vsel %vm167_vm9, nan, %v177_v22 }
  0xe7   :  { %283 = vst [vmem:[#allocation2] sm:$0xff] %v178_v31 }
  0xe8   :  { %353 = shalt.err (!%p350_p4)
}
  0xe9   :  { %s374_s20 = smov 128   ;;  %s375_s21 = smov 8  }
  0xea   :  { %296 = dma.vmem_to_hbm [thread:$0]  %s291_s2, 256, %s484_s3, [#allocation3], %s374_s20, %s374_s20, %s375_s21  }
  0xeb   :  { %362 = dma.done.wait [#allocation3], 256  }
  0xec   :  { %363 = vsyncadd [#allocation3], 4294967040 }
  0xed   :  { %300 = vsyncpa [#allocation3], 1 }

</bundles_post_ra>
